<compile_context>
chip_gen: v5e
topology: v5e:2x2
jax: 0.10.0
libtpu: 0.0.40
codegen_flags: <defaults>
</compile_context>

<pallas_src>
import functools

import jax
import jax.numpy as jnp
from jax.experimental import pallas as pl
from jax.experimental.pallas import tpu as pltpu


def _bvp_energy_kernel(d_ref, g_ref, o_ref, acc_ref, *, inv_pairs, tile_k):
    """One grid step over a row-tile of G (the contraction dimension).

    d_ref:   ((T-1)*3, N)   coords-major frame-difference slab, VMEM (resident).
    g_ref:   (TILE_K, N)    row tile of G = L^T L, VMEM (pipelined over the grid).
    o_ref:   (1, 1) f32     scalar energy output, SMEM.
    acc_ref: (1,)   f32     SMEM scratch accumulator (persists across grid steps).
    """
    k = pl.program_id(0)

    @pl.when(k == 0)
    def _init():
        acc_ref[0] = jnp.float32(0.0)

    # Lane-aligned slice of the resident diff slab for this contraction tile.
    off = pl.multiple_of(k * tile_k, tile_k)
    d_k = d_ref[:, pl.ds(off, tile_k)]                                  # (M, TILE_K)

    # Plain untransposed MXU matmul, f32 accumulation.
    z = jnp.dot(d_k, g_ref[...], preferred_element_type=jnp.float32)   # (M, N)

    # E partial = sum_ij z[i, j] * d[i, j]   (d^T G d -- no explicit square needed).
    acc_ref[0] += jnp.sum(z * d_ref[...].astype(jnp.float32))

    @pl.when(k == pl.num_programs(0) - 1)
    def _finalize():
        o_ref[0, 0] = acc_ref[0] * jnp.float32(inv_pairs)


def _pick_tile_k(n):
    """Contraction tile: 512/256 match v6e/v7x MXU depth, 128 fits v5e exactly."""
    for t in (512, 256, 128):
        if n % t == 0:
            return t
    return n  # non-multiple-of-128 lane count: single full-width block


def make_gram(stiffness):
    """G = L^T L; constant across the optimization -> compute once and cache."""
    l = jnp.asarray(stiffness, jnp.float32)
    return l.T @ l


def bvp_forward(vert_sequence, gram, *, use_bf16=False):
    """Pallas equivalent of InterpolationModuleBvp.forward().

    vert_sequence: (T, N, 3) float32 -- learnable vertex sequence (Parameter).
    gram:          (N, N)    float32 -- precomputed G = L^T L of the quadratic energy.
    use_bf16:      cast matmul operands to bf16 (f32 accumulation) for large N,
                   where the kernel is G-bandwidth-bound.
    Returns (E_total, [E_total]) to mirror the torch module's return signature.

    NOTE: the matmul M dimension is only (T-1)*3 rows; to recover MXU row
    occupancy, batch multiple vertex sequences into M rather than calling per
    sequence.
    """
    T, N, _ = vert_sequence.shape
    m = (T - 1) * 3

    v = vert_sequence.astype(jnp.float32)
    # Frame diffs + coords-major layout, done host/XLA-side in one fused tiny op:
    # d[(t*3)+c, :] = v_{t+1}[c, :] - v_t[c, :]   -> ((T-1)*3, N), N on lanes.
    d = jnp.transpose(v[1:] - v[:-1], (0, 2, 1)).reshape(m, N)

    compute_dtype = jnp.bfloat16 if use_bf16 else jnp.float32
    d_in = d.astype(compute_dtype)
    g_in = jnp.asarray(gram, compute_dtype)
    itemsize = jnp.dtype(compute_dtype).itemsize

    tile_k = _pick_tile_k(N)
    num_k = N // tile_k if N % tile_k == 0 else 1

    # Scoped-VMEM ceiling: double-buffered G tile + resident d + headroom,
    # clamped to stay valid on every generation (v7x physical VMEM is 64 MiB).
    vmem_need = 2 * tile_k * N * itemsize + 2 * m * N * 4 + (2 << 20)
    vmem_limit = int(min(max(vmem_need, 32 << 20), 64 << 20))

    cost = pl.CostEstimate(
        flops=2 * m * N * N + 2 * m * N,
        transcendentals=0,
        bytes_accessed=itemsize * (N * N + m * N) + 4 * m * N + 4,
    )

    kernel = functools.partial(
        _bvp_energy_kernel, inv_pairs=1.0 / (T - 1), tile_k=tile_k)

    out = pl.pallas_call(
        kernel,
        out_shape=jax.ShapeDtypeStruct((1, 1), jnp.float32),
        grid_spec=pltpu.PrefetchScalarGridSpec(
            num_scalar_prefetch=0,
            grid=(num_k,),
            in_specs=[
                # diff slab: same block every step -> stays resident in VMEM.
                pl.BlockSpec((m, N), lambda k: (0, 0),
                             memory_space=pltpu.VMEM),
                # G row-tile: streamed / double-buffered over the reduction axis.
                pl.BlockSpec((tile_k, N), lambda k: (k, 0),
                             memory_space=pltpu.VMEM),
            ],
            out_specs=pl.BlockSpec((1, 1), lambda k: (0, 0),
                                   memory_space=pltpu.SMEM),
            scratch_shapes=[pltpu.SMEM((1,), jnp.float32)],
        ),
        compiler_params=pltpu.CompilerParams(
            dimension_semantics=("arbitrary",),
            vmem_limit_bytes=vmem_limit,
        ),
        cost_estimate=cost,
    )(d_in, g_in)

    e_total = out[0, 0]
    return e_total, [e_total]


# ---------------------------------------------------------------- glue (JAX) --

def compute_vertices(vert_x, vert_y, num_t):
    """Linear interpolation init, mirrors InterpolationModuleBvp.compute_vertices."""
    lam = jnp.linspace(0.0, 1.0, num_t, dtype=jnp.float32)[:, None, None]
    return (1.0 - lam) * vert_x[None, ...] + lam * vert_y[None, ...]


def ring_laplacian(n):
    """Deterministic (N, N) stiffness matrix standing in for the shape_x operator."""
    eye = jnp.eye(n, dtype=jnp.float32)
    return 2.0 * eye - jnp.roll(eye, 1, axis=1) - jnp.roll(eye, -1, axis=1)


def bvp_forward_reference(vert_sequence, stiffness):
    """Pure-JAX reference of the same forward pass (||L d||_F^2 form)."""
    T = vert_sequence.shape[0]
    d = vert_sequence[1:] - vert_sequence[:-1]               # (T-1, N, 3)
    z = jnp.einsum("ij,tjk->tik", stiffness, d)              # (T-1, N, 3)
    return jnp.sum(z * z) / (T - 1)


if __name__ == "__main__":
    num_t = 5          # param.num_timesteps (small)
    num_vert = 128     # shape_x.get_vert_shape()[0]

    key = jax.random.PRNGKey(0)
    k_x, k_y, k_p = jax.random.split(key, 3)
    vert_x = jax.random.normal(k_x, (num_vert, 3), dtype=jnp.float32)
    vert_y = jax.random.normal(k_y, (num_vert, 3), dtype=jnp.float32)

    # Parameter init as in the module (linear interpolation), plus a small
    # deterministic perturbation to emulate a mid-optimization state.
    vert_seq = compute_vertices(vert_x, vert_y, num_t)
    vert_seq = vert_seq + 0.05 * jax.random.normal(k_p, vert_seq.shape,
                                                   dtype=jnp.float32)

    L = ring_laplacian(num_vert)
    G = make_gram(L)   # precomputed once; reused across every optimizer step

    e_total, e_list = bvp_forward(vert_seq, G)
    e_total = jax.block_until_ready(e_total)

    e_ref = bvp_forward_reference(vert_seq, L)
    assert jnp.allclose(e_total, e_ref, rtol=1e-4, atol=1e-5), (e_total, e_ref)
    assert len(e_list) == 1

    print("KERNEL_OK")
</pallas_src>

<mosaic_0001>
module attributes {stable_mosaic.version = 11 : i64} {
  func.func @_bvp_energy_kernel(%arg0: i32, %arg1: memref<12x128xf32, #tpu.memory_space<vmem>>, %arg2: memref<128x128xf32, #tpu.memory_space<vmem>>, %arg3: memref<1x1xf32, #tpu.memory_space<smem>>, %arg4: memref<1xf32, #tpu.memory_space<smem>>) attributes {dimension_semantics = [#tpu.dimension_semantics<arbitrary>], iteration_bounds = array<i64: 1>, scalar_prefetch = 0 : i64, scratch_operands = 1 : i64, tpu.core_type = #tpu.core_type<tc>, window_params = [{pipeline_mode = #tpu.pipeline_mode<synchronous>, transform_indices = @transform_0, window_bounds = array<i64: 12, 128>}, {transform_indices = @transform_1, window_bounds = array<i64: 128, 128>}, {transform_indices = @transform_2, window_bounds = array<i64: 1, 1>}]} {
    %c0_i32 = arith.constant 0 : i32
    %0 = arith.cmpi eq, %arg0, %c0_i32 : i32
    %1 = arith.extui %0 : i1 to i32
    %c0_i32_0 = arith.constant 0 : i32
    %2 = arith.cmpi ne, %1, %c0_i32_0 : i32
    scf.if %2 {
      %cst_10 = arith.constant 0.000000e+00 : f32
      %c0_11 = arith.constant 0 : index
      %21 = memref.load %arg4[%c0_11] : memref<1xf32, #tpu.memory_space<smem>>
      memref.store %cst_10, %arg4[%c0_11] : memref<1xf32, #tpu.memory_space<smem>>
    } else {
    }
    %c128_i32 = arith.constant 128 : i32
    %3 = arith.muli %arg0, %c128_i32 : i32
    %4 = tpu.assume_multiple %3, 128 : i32
    %c0 = arith.constant 0 : index
    %5 = arith.index_cast %4 : i32 to index
    %6 = vector.load %arg1[%c0, %5] : memref<12x128xf32, #tpu.memory_space<vmem>>, vector<12x128xf32>
    %c0_1 = arith.constant 0 : index
    %c0_2 = arith.constant 0 : index
    %7 = vector.load %arg2[%c0_1, %c0_2] : memref<128x128xf32, #tpu.memory_space<vmem>>, vector<128x128xf32>
    %cst = arith.constant dense<0.000000e+00> : vector<12x128xf32>
    %8 = tpu.matmul %6, %7, %cst {dimension_numbers = #tpu.dot_dimension_numbers<[1], [0], [0], [1], [0, 0, 1, 1], [], []>} : vector<12x128xf32>, vector<128x128xf32>, vector<12x128xf32> -> vector<12x128xf32>
    %c0_3 = arith.constant 0 : index
    %9 = memref.load %arg4[%c0_3] : memref<1xf32, #tpu.memory_space<smem>>
    %c0_4 = arith.constant 0 : index
    %c0_5 = arith.constant 0 : index
    %10 = vector.load %arg1[%c0_4, %c0_5] : memref<12x128xf32, #tpu.memory_space<vmem>>, vector<12x128xf32>
    %11 = arith.mulf %8, %10 : vector<12x128xf32>
    %12 = vector.shape_cast %11 : vector<12x128xf32> to vector<1x12x128xf32>
    %cst_6 = arith.constant dense<0.000000e+00> : vector<1xf32>
    %13 = vector.multi_reduction <add>, %12, %cst_6 [1, 2] : vector<1x12x128xf32> to vector<1xf32>
    %14 = vector.shape_cast %13 : vector<1xf32> to vector<1x1x1xf32>
    %15 = vector.extract %14[0, 0, 0] : f32 from vector<1x1x1xf32>
    %16 = arith.addf %9, %15 : f32
    %c0_7 = arith.constant 0 : index
    %17 = memref.load %arg4[%c0_7] : memref<1xf32, #tpu.memory_space<smem>>
    memref.store %16, %arg4[%c0_7] : memref<1xf32, #tpu.memory_space<smem>>
    %c0_i32_8 = arith.constant 0 : i32
    %18 = arith.cmpi eq, %arg0, %c0_i32_8 : i32
    %19 = arith.extui %18 : i1 to i32
    %c0_i32_9 = arith.constant 0 : i32
    %20 = arith.cmpi ne, %19, %c0_i32_9 : i32
    scf.if %20 {
      %c0_10 = arith.constant 0 : index
      %21 = memref.load %arg4[%c0_10] : memref<1xf32, #tpu.memory_space<smem>>
      %cst_11 = arith.constant 2.500000e-01 : f32
      %22 = arith.mulf %21, %cst_11 : f32
      %c0_12 = arith.constant 0 : index
      %c0_13 = arith.constant 0 : index
      %23 = memref.load %arg3[%c0_12, %c0_13] : memref<1x1xf32, #tpu.memory_space<smem>>
      memref.store %22, %arg3[%c0_12, %c0_13] : memref<1x1xf32, #tpu.memory_space<smem>>
    } else {
    }
    return
  }
  func.func @transform_0(%arg0: i32) -> (i32, i32) {
    %c0_i32 = arith.constant 0 : i32
    %c0_i32_0 = arith.constant 0 : i32
    %c0_i32_1 = arith.constant 0 : i32
    return %c0_i32, %c0_i32_0 : i32, i32
  }
  func.func @transform_1(%arg0: i32) -> (i32, i32) {
    %c0_i32 = arith.constant 0 : i32
    %c0_i32_0 = arith.constant 0 : i32
    return %arg0, %c0_i32 : i32, i32
  }
  func.func @transform_2(%arg0: i32) -> (i32, i32) {
    %c0_i32 = arith.constant 0 : i32
    %c0_i32_0 = arith.constant 0 : i32
    %c0_i32_1 = arith.constant 0 : i32
    return %c0_i32, %c0_i32_0 : i32, i32
  }
}

</mosaic_0001>

<bundles_post_ra>
// kernel: tpu_custom_call.1
= control target key start
LH: loop header
LB: loop body
LE: loop exit
PB: predicated region body
PF: predicated region fallthrough
CT: control target
= control target key end

     0   :  { %7 = vsyncpa [#allocation4], 0  ;;  %s258_s0 = inlined_call_operand.hbm [shape: f32[12,128], index: 0, kind: input, shape index: {}]   ;;  %s259_s1 = inlined_call_operand.hbm [shape: f32[128,128], index: 1, kind: input, shape index: {}]   ;;  %s260_s2 = inlined_call_operand.hbm [shape: f32[1,1], index: 2, kind: output, shape index: {}]  }
   0x1   :  { %8 = vsyncpa [#allocation7], 0 }
   0x2   :  { %9 = vsyncpa [#allocation5], 0  ;;  %s14_s11 = sshll.u32 %s258_s0, 4  ;;  %s229_s12 = smov [#allocation3]   ;;  %s15_s11 = int_to_ptr.hbm [resolvable:$true] %s14_s11 }
   0x3   :  { %s16_s13 = sshll.u32 %s229_s12, 4  ;;  %s27_s16 = sshll.u32 %s259_s1, 4  ;;  %s17_s13 = int_to_ptr.vmem [resolvable:$true] %s16_s13  ;;  %s28_s16 = int_to_ptr.hbm [resolvable:$true] %s27_s16 }
   0x4   :  { %s230_s17 = smov 128   ;;  %s231_s18 = smov 8  }
   0x5   :  { %22 = dma.hbm_to_vmem [thread:$0]  %s15_s11, 256, %s17_s13, [#allocation4], %s230_s17, %s230_s17, %s231_s18  }
   0x6   :  { %s232_s19 = smov [#allocation6]  }
   0x7   :  { %s29_s20 = sshll.u32 %s232_s19, 4  ;;  %s30_s20 = int_to_ptr.vmem [resolvable:$true] %s29_s20 }
   0x8   :  { %35 = dma.hbm_to_vmem [thread:$0]  %s28_s16, 2048, %s30_s20, [#allocation7], %s230_s17, %s230_s17, %s231_s18  }
   0x9   :  { %223 = dma.done.wait [#allocation4], 256  }
   0xa   :  { %224 = vsyncadd [#allocation4], 4294967040 }
   0xb   :  { %225 = dma.done.wait [#allocation7], 2048  }
   0xc   :  { %226 = vsyncadd [#allocation7], 4294965248  ;;  %v71_v0 = vld [vmem:[#allocation6 + $0x78] sm:$0xff]  ;;  %v70_v1 = vld [vmem:[#allocation6 + $0x70] sm:$0xff]  ;;  %vm100_vm0 = vcmask 1043456   ;;  %s127_s21 = sshll.u32 %s260_s2, 4  ;;  %s128_s21 = int_to_ptr.hbm [resolvable:$true] %s127_s21 }
   0xd   :  { %140 = vmatpush.msra.mxu1 %v71_v0  ;;  %72 = vmatpush.msra.mxu0 %v71_v0  ;;  %v69_v2 = vld [vmem:[#allocation6 + $0x68] sm:$0xff]  ;;  %v68_v3 = vld [vmem:[#allocation6 + $0x60] sm:$0xff]  ;;  %v67_v4 = vld [vmem:[#allocation6 + $0x58] sm:$0xff]  ;;  %s233_s24 = smov [#allocation8]  }
   0xe   :  { %v66_v5 = vld [vmem:[#allocation6 + $0x50] sm:$0xff]  ;;  %v65_v6 = vld [vmem:[#allocation6 + $0x48] sm:$0xff]  ;;  %v64_v7 = vld [vmem:[#allocation6 + $0x40] sm:$0xff] }
   0xf   :  { %141 = vmatpush.msra.mxu1 %v70_v1  ;;  %73 = vmatpush.msra.mxu0 %v70_v1  ;;  %v63_v8 = vld [vmem:[#allocation6 + $0x38] sm:$0xff]  ;;  %v62_v9 = vld [vmem:[#allocation6 + $0x30] sm:$0xff]  ;;  %v61_v10 = vld [vmem:[#allocation6 + $0x28] sm:$0xff] }
  0x10   :  { %v60_v11 = vld [vmem:[#allocation6 + $0x20] sm:$0xff]  ;;  %v59_v12 = vld [vmem:[#allocation6 + $0x18] sm:$0xff]  ;;  %v58_v13 = vld [vmem:[#allocation6 + $0x10] sm:$0xff] }
  0x11   :  { %142 = vmatpush.msra.mxu1 %v69_v2  ;;  %74 = vmatpush.msra.mxu0 %v69_v2  ;;  %v57_v14 = vld [vmem:[#allocation6 + $0x8] sm:$0xff]  ;;  %v56_v15 = vld [vmem:[#allocation6] sm:$0xff]  ;;  %v55_v16 = vld [vmem:[#allocation3 + $0x8] sm:$0xf] }
  0x12   :  { %v54_v17 = vld [vmem:[#allocation3] sm:$0xff]  ;;  %v97_v18 = vld [vmem:[#allocation3 + $0x8] sm:$0xf] }
  0x13   :  { %143 = vmatpush.msra.mxu1 %v68_v3  ;;  %75 = vmatpush.msra.mxu0 %v68_v3 }
  0x15   :  { %144 = vmatpush.msra.mxu1 %v67_v4  ;;  %76 = vmatpush.msra.mxu0 %v67_v4 }
  0x17   :  { %145 = vmatpush.msra.mxu1 %v66_v5  ;;  %77 = vmatpush.msra.mxu0 %v66_v5 }
  0x19   :  { %146 = vmatpush.msra.mxu1 %v65_v6  ;;  %78 = vmatpush.msra.mxu0 %v65_v6 }
  0x1b   :  { %147 = vmatpush.msra.mxu1 %v64_v7  ;;  %79 = vmatpush.msra.mxu0 %v64_v7 }
  0x1d   :  { %148 = vmatpush.msra.mxu1 %v63_v8  ;;  %80 = vmatpush.msra.mxu0 %v63_v8 }
  0x1f   :  { %149 = vmatpush.msra.mxu1 %v62_v9  ;;  %81 = vmatpush.msra.mxu0 %v62_v9 }
  0x21   :  { %150 = vmatpush.msra.mxu1 %v61_v10  ;;  %82 = vmatpush.msra.mxu0 %v61_v10 }
  0x23   :  { %151 = vmatpush.msra.mxu1 %v60_v11  ;;  %83 = vmatpush.msra.mxu0 %v60_v11 }
  0x25   :  { %152 = vmatpush.msra.mxu1 %v59_v12  ;;  %84 = vmatpush.msra.mxu0 %v59_v12 }
  0x27   :  { %153 = vmatpush.msra.mxu1 %v58_v13  ;;  %85 = vmatpush.msra.mxu0 %v58_v13 }
  0x29   :  { %154 = vmatpush.msra.mxu1 %v57_v14  ;;  %86 = vmatpush.msra.mxu0 %v57_v14 }
  0x2b   :  { %155 = vmatpush.msra.mxu1 %v56_v15  ;;  %87 = vmatpush.msra.mxu0 %v56_v15 }
  0x2c   :  { %91 = vmatmul.f32.vlgmr.msra.gmra.mxu1 %v55_v16  ;;  %88 = vmatmul.f32.vlgmr.msra.gmra.mxu0 %v54_v17 }
  0xa9   :  { %v92_v19 = vpop.f32.mrf.mxu1  ;;  %v89_v20 = vpop.f32.mrf.mxu0 }
  0xaa   :  { %v99_v21 = vmul.f32 %v97_v18, %v92_v19  ;;  %v98_v22 = vmul.f32 %v89_v20, %v54_v17 }
  0xac   :  { %v101_v23 = vsel %vm100_vm0, %v99_v21, 0.0 }
  0xad   :  { %v102_v24 = vadd.f32 %v101_v23, %v98_v22 }
  0xaf   :  { %103 = vadd.xlane.f32.xlu0 %v102_v24 }
 0x122   :  { %v104_v25 = vpop.xlane.xlu0 %103 }
 0x123   :  { %v105_v26 = vrot.slane %v104_v25, 4 }
 0x125   :  { %v106_v27 = vadd.f32 %v105_v26, %v104_v25 }
 0x127   :  { %v107_v28 = vrot.slane %v106_v27, 2 }
 0x129   :  { %v108_v29 = vadd.f32 %v107_v28, %v106_v27 }
 0x12b   :  { %v109_v30 = vrot.slane %v108_v29, 1 }
 0x12d   :  { %v110_v31 = vadd.f32 %v109_v30, %v108_v29 }
 0x12f   :  { %156 = vpush %v110_v31 }
 0x160   :  { %s157_s22 = spop %156 }
 0x161   :  { %s119_s23 = smul.f32 0.25, %s157_s22 }
 0x163   :  { %121 = sst [smem:[#allocation8]] %s119_s23 }
 0x164   :  { %130 = dma.smem_to_hbm %s233_s24, 16, %s128_s21, [#allocation5]  }
 0x165   :  { %227 = dma.done.wait [#allocation5], 16  }
 0x166   :  { %228 = vsyncadd [#allocation5], 4294967280 }
 0x167   :  { %135 = sfence }
 0x168   :  { %136 = vsyncpa [#allocation4], 1 }
 0x169   :  { %137 = vsyncpa [#allocation7], 1 }
 0x16a   :  { %138 = vsyncpa [#allocation5], 1 }

</bundles_post_ra>
